<compile_context>
chip_gen: v5e
topology: v5e:2x2
jax: 0.10.0
libtpu: 0.0.40
codegen_flags: <defaults>
</compile_context>

<pallas_src>
import functools

import jax
import jax.numpy as jnp
from jax.experimental import pallas as pl
from jax.experimental.pallas import tpu as pltpu


INPUT_SIZE = 27
HIDDEN_SIZE = 96
OUTPUT_SIZE = 9


def policy_kernel(x_ref, wct_ref, bct_ref, out_ref):
    """One batch tile of the fused Policy forward, batch on the lane axis.

    x   : (TB, 27)  batch tile (loaded as-is, no transpose needed)
    wct : (9, 27)   folded weight (w1 @ w2), pre-transposed
    bct : (9, 1)    folded bias  (b1 @ w2 + b2), as a column
    out : (9, TB)   softmax probabilities, transposed (lane-dense)
    """
    x = x_ref[...]
    # logits_t[a, b] = sum_k wct[a, k] * x[b, k]  -> (9, TB); contraction on
    # both minor dims (the "A @ B^T" MXU pattern), no explicit transpose.
    logits_t = jax.lax.dot_general(
        wct_ref[...], x,
        dimension_numbers=(((1,), (1,)), ((), ())),
        preferred_element_type=jnp.float32,
    ) + bct_ref[...]
    # Numerically stable softmax along the action axis (axis 0 here == dim=1
    # of the original (B, 9) layout).  max/sum are short 9-sublane reduces;
    # the divide is exact (one lane-dense (1, TB) row) to stay well inside
    # the reference tolerance.
    m = jnp.max(logits_t, axis=0, keepdims=True)
    e = jnp.exp(logits_t - m)
    denom = jnp.sum(e, axis=0, keepdims=True)
    out_ref[...] = (e / denom).astype(out_ref.dtype)


def fold_params(w1, b1, w2, b2):
    """Fold Linear(27->96) . Linear(96->9) (no nonlinearity between them) into
    a single affine map, pre-transposed for the lane-dense kernel layout.
    Call ONCE per parameter set (off the per-step hot path)."""
    wct = jnp.dot(w1, w2, preferred_element_type=jnp.float32).T          # (9, 27)
    bct = (jnp.dot(b1, w2, preferred_element_type=jnp.float32) + b2).T   # (9, 1)
    return wct, bct


def _choose_tile(batch, block_batch):
    """Batch tile: lane dim of the (9, TB) output must be a multiple of 128
    unless it equals the full batch; keep >=2 blocks so both v7x TensorCores
    get work when the batch is big enough."""
    if batch <= 128:
        return batch                       # single block; block dims == array dims
    tb = min(block_batch, batch)
    tb = min(tb, -(-batch // 2))           # keep at least 2 grid blocks
    tb = max(128, (tb // 128) * 128)       # 128-lane alignment for the output
    return tb


@functools.partial(jax.jit, static_argnames=("block_batch",))
def policy_forward_folded(x, wct, bct, *, block_batch=4096):
    """Fused Policy forward with pre-folded parameters.

    x : (B, 27) float32 -> (B, 9) float32 probabilities (rows sum to 1).
    """
    batch = x.shape[0]
    tb = _choose_tile(batch, block_batch)
    grid = (pl.cdiv(batch, tb),)

    out_t = pl.pallas_call(
        policy_kernel,
        out_shape=jax.ShapeDtypeStruct((OUTPUT_SIZE, batch), jnp.float32),
        grid=grid,
        in_specs=[
            pl.BlockSpec((tb, INPUT_SIZE), lambda i: (i, 0)),            # x: batch-tiled
            pl.BlockSpec((OUTPUT_SIZE, INPUT_SIZE), lambda i: (0, 0)),   # Wc^T: broadcast
            pl.BlockSpec((OUTPUT_SIZE, 1), lambda i: (0, 0)),            # bc^T: broadcast
        ],
        out_specs=pl.BlockSpec((OUTPUT_SIZE, tb), lambda i: (0, i)),     # lane-dense store
        compiler_params=pltpu.CompilerParams(
            dimension_semantics=("parallel",),  # shard batch blocks across TCs on v7x
        ),
        cost_estimate=pl.CostEstimate(
            flops=2 * INPUT_SIZE * OUTPUT_SIZE * batch,
            transcendentals=OUTPUT_SIZE * batch,
            bytes_accessed=(INPUT_SIZE + OUTPUT_SIZE) * 4 * batch,
        ),
    )(x, wct, bct)

    # Back to the module's (B, 9) layout.  If a downstream consumer can take
    # (9, B) directly, return out_t instead and skip this transpose.
    return out_t.T


def policy_forward(x, w1, b1, w2, b2, *, block_batch=4096):
    """Convenience wrapper matching the original module signature."""
    wct, bct = fold_params(w1, b1, w2, b2)
    return policy_forward_folded(x, wct, bct, block_batch=block_batch)


def init_params(key, input_size=INPUT_SIZE, hidden_size=HIDDEN_SIZE,
                output_size=OUTPUT_SIZE):
    """Deterministic synthetic parameters matching nn.Linear init ranges.

    PyTorch stores Linear weight as (out, in); we store the transpose
    (in, out) so the math is x @ W.  Biases are kept 2D (1, out).
    """
    k1, k2, k3, k4 = jax.random.split(key, 4)
    bound1 = 1.0 / (input_size ** 0.5)
    bound2 = 1.0 / (hidden_size ** 0.5)
    w1 = jax.random.uniform(k1, (input_size, hidden_size), jnp.float32,
                            minval=-bound1, maxval=bound1)
    b1 = jax.random.uniform(k2, (1, hidden_size), jnp.float32,
                            minval=-bound1, maxval=bound1)
    w2 = jax.random.uniform(k3, (hidden_size, output_size), jnp.float32,
                            minval=-bound2, maxval=bound2)
    b2 = jax.random.uniform(k4, (1, output_size), jnp.float32,
                            minval=-bound2, maxval=bound2)
    return w1, b1, w2, b2


def policy_reference(x, w1, b1, w2, b2):
    """Reference with the module's original two-matmul structure."""
    h = x @ w1 + b1
    logits = h @ w2 + b2
    return jax.nn.softmax(logits, axis=1)


if __name__ == "__main__":
    key = jax.random.PRNGKey(0)
    kx, kp = jax.random.split(key)

    w1, b1, w2, b2 = init_params(kp)
    wct, bct = fold_params(w1, b1, w2, b2)   # fold once, off the hot path

    cases = (
        (256, 128),    # 2-block grid: exercises batch tiling / megacore split
        (200, 128),    # ragged last block: exercises masked lane-dense store
        (32, 4096),    # single-block small-batch path
    )
    for batch, block_batch in cases:
        x = jax.random.uniform(jax.random.fold_in(kx, batch),
                               (batch, INPUT_SIZE), jnp.float32)
        out = jax.block_until_ready(
            policy_forward_folded(x, wct, bct, block_batch=block_batch))
        ref = policy_reference(x, w1, b1, w2, b2)

        assert out.shape == (batch, OUTPUT_SIZE)
        assert jnp.allclose(out, ref, atol=1e-5, rtol=1e-5), \
            f"mismatch vs reference (batch={batch})"
        assert jnp.allclose(jnp.sum(out, axis=1), jnp.ones((batch,)), atol=1e-5), \
            f"softmax rows do not sum to 1 (batch={batch})"

    print("KERNEL_OK")
</pallas_src>

<mosaic_0001>
module attributes {stable_mosaic.version = 11 : i64} {
  func.func @policy_kernel(%arg0: i32, %arg1: memref<128x27xf32, #tpu.memory_space<vmem>>, %arg2: memref<9x27xf32, #tpu.memory_space<vmem>>, %arg3: memref<9x1xf32, #tpu.memory_space<vmem>>, %arg4: memref<9x128xf32, #tpu.memory_space<vmem>>) attributes {dimension_semantics = [#tpu.dimension_semantics<parallel>], iteration_bounds = array<i64: 2>, scalar_prefetch = 0 : i64, scratch_operands = 0 : i64, tpu.core_type = #tpu.core_type<tc>, window_params = [{transform_indices = @transform_0, window_bounds = array<i64: 128, 27>}, {pipeline_mode = #tpu.pipeline_mode<synchronous>, transform_indices = @transform_1, window_bounds = array<i64: 9, 27>}, {pipeline_mode = #tpu.pipeline_mode<synchronous>, transform_indices = @transform_2, window_bounds = array<i64: 9, 1>}, {transform_indices = @transform_3, window_bounds = array<i64: 9, 128>}]} {
    %c0 = arith.constant 0 : index
    %c0_0 = arith.constant 0 : index
    %0 = vector.load %arg1[%c0, %c0_0] : memref<128x27xf32, #tpu.memory_space<vmem>>, vector<128x27xf32>
    %c0_1 = arith.constant 0 : index
    %c0_2 = arith.constant 0 : index
    %1 = vector.load %arg2[%c0_1, %c0_2] : memref<9x27xf32, #tpu.memory_space<vmem>>, vector<9x27xf32>
    %cst = arith.constant dense<0.000000e+00> : vector<9x128xf32>
    %2 = tpu.matmul %1, %0, %cst {dimension_numbers = #tpu.dot_dimension_numbers<[1], [1], [0], [0], [0, 0, 1, 0], [], []>} : vector<9x27xf32>, vector<128x27xf32>, vector<9x128xf32> -> vector<9x128xf32>
    %c0_3 = arith.constant 0 : index
    %c0_4 = arith.constant 0 : index
    %3 = vector.load %arg3[%c0_3, %c0_4] : memref<9x1xf32, #tpu.memory_space<vmem>>, vector<9x1xf32>
    %4 = vector.broadcast %3 : vector<9x1xf32> to vector<9x128xf32>
    %5 = arith.addf %2, %4 : vector<9x128xf32>
    %cst_5 = arith.constant dense<0xFF800000> : vector<128xf32>
    %6 = vector.multi_reduction <maximumf>, %5, %cst_5 [0] : vector<9x128xf32> to vector<128xf32>
    %7 = vector.shape_cast %6 : vector<128xf32> to vector<1x128xf32>
    %8 = vector.broadcast %7 : vector<1x128xf32> to vector<9x128xf32>
    %9 = arith.subf %5, %8 : vector<9x128xf32>
    %10 = math.exp %9 : vector<9x128xf32>
    %cst_6 = arith.constant dense<0.000000e+00> : vector<128xf32>
    %11 = vector.multi_reduction <add>, %10, %cst_6 [0] : vector<9x128xf32> to vector<128xf32>
    %12 = vector.shape_cast %11 : vector<128xf32> to vector<1x128xf32>
    %13 = vector.broadcast %12 : vector<1x128xf32> to vector<9x128xf32>
    %14 = arith.divf %10, %13 : vector<9x128xf32>
    %c0_7 = arith.constant 0 : index
    %c0_8 = arith.constant 0 : index
    %15 = vector.load %arg4[%c0_7, %c0_8] : memref<9x128xf32, #tpu.memory_space<vmem>>, vector<9x128xf32>
    tpu.vector_store %arg4[%c0_7, %c0_8], %14 {strides = array<i32>} : memref<9x128xf32, #tpu.memory_space<vmem>>, vector<9x128xf32>,
    return
  }
  func.func @transform_0(%arg0: i32) -> (i32, i32) {
    %c0_i32 = arith.constant 0 : i32
    %c0_i32_0 = arith.constant 0 : i32
    return %arg0, %c0_i32 : i32, i32
  }
  func.func @transform_1(%arg0: i32) -> (i32, i32) {
    %c0_i32 = arith.constant 0 : i32
    %c0_i32_0 = arith.constant 0 : i32
    %c0_i32_1 = arith.constant 0 : i32
    return %c0_i32, %c0_i32_0 : i32, i32
  }
  func.func @transform_2(%arg0: i32) -> (i32, i32) {
    %c0_i32 = arith.constant 0 : i32
    %c0_i32_0 = arith.constant 0 : i32
    %c0_i32_1 = arith.constant 0 : i32
    return %c0_i32, %c0_i32_0 : i32, i32
  }
  func.func @transform_3(%arg0: i32) -> (i32, i32) {
    %c0_i32 = arith.constant 0 : i32
    %c0_i32_0 = arith.constant 0 : i32
    return %c0_i32, %arg0 : i32, i32
  }
}

</mosaic_0001>

<bundles_post_ra>
// kernel: policy_forward_folded.1
= control target key start
LH: loop header
LB: loop body
LE: loop exit
PB: predicated region body
PF: predicated region fallthrough
CT: control target
= control target key end

     0   :  { %8 = vsyncpa [#allocation3], 0  ;;  %s730_s0 = inlined_call_operand.vmem [shape: f32[256,27], index: 0, kind: input, shape index: {}]   ;;  %s731_s1 = inlined_call_operand.vmem [shape: f32[9,27], index: 1, kind: input, shape index: {}]   ;;  %s732_s2 = inlined_call_operand.vmem [shape: f32[9,1], index: 2, kind: input, shape index: {}]   ;;  %s733_s3 = inlined_call_operand.hbm [shape: f32[9,256], index: 3, kind: output, shape index: {}]  }
   0x1   :  { %10 = vsyncpa [#allocation3 + $0x1], 0  ;;  %s580_s12 = smov 0   ;;  %s582_s13 = smov 0  }
   0x2   :  { %s584_s14 = smov 0   ;;  %s586_s15 = smov 0  }
   0x3 LB: > { %s601_s16 = sadd.s32 4294967295, %s554_s15   ;;  %s397_s17 = sadd.s32 4294967294, %s554_s15   ;;  %s554_s15 = sphi %s586_s15, %s739_s15   ;;  %s550_s14 = sphi %s584_s14, %s738_s14   ;;  %s546_s13 = sphi %s582_s13, %s737_s13   ;;  %s542_s12 = sphi %s580_s12, %s736_s12  }
   0x4   : > { %s605_s18 = sadd.s32 1, %s554_s15   ;;  %s91_s19 = sadd.s32 1, %s550_s14 }
   0x5   : > { %s88_s20 = ssub.s32 %s554_s15, %s605_s18  ;;  %p101_p0 = scmp.ne.s32.totalorder %s550_s14, %s546_s13 }
   0x6   : > { %p89_p1 = scmp.eq.s32.totalorder %s88_s20, 0  ;;  %p102_p2 = scmp.eq.s32.totalorder %s601_s16, 1 }
   0x7   : > { %p107_p3 = scmp.ne.s32.totalorder %s546_s13, %s542_s12  ;;  %p108_p4 = scmp.eq.s32.totalorder %s397_s17, 1 }
   0x8   : > { %s616_s21 = scalar_select %p89_p1, %s550_s14, %s91_s19  }
   0x9   : > { %p618_p5 = por %p102_p2, %p101_p0  ;;  %p622_p6 = por %p108_p4, %p107_p3 }
   0xa   : > { %p400_p7 = scmp.ge.s32.totalorder %s554_s15, 1  ;;  %p141_p8 = scmp.lt.s32.totalorder %s554_s15, 3 }
   0xc   : > { %p142_p9 = pnand %p400_p7, %p141_p8 }
   0xd   : > { %s402_s24 = sshll.u32 (!%p142_p9), %s601_s16, 4  ;;  %s162_s10 = sand.u32 (!%p142_p9), 1, %s546_s13  }
   0xe   : > { %145 = sbr.rel (%p142_p9) target bundleno = 281 (0x119), region = 32  ;;  %p166_p10 = scmp.lt.s32.totalorder (!%p142_p9), %s402_s24, 31 }
   0xf   : > { %s401_s11 = sshll.u32 (!%p142_p9), %s162_s10, 4  ;;  %s423_s17 = sshll.u32 (!%p142_p9), %s601_s16, 3 }
  0x10   : > { %s321_s16 = scalar_lea.sflag (!%p142_p9), [#allocation3], %s162_s10  ;;  %s512_s5 = scalar_lea.hbm (!%p142_p9), %s733_s3, 32 }
  0x13   : > { %s741_s24 = smov (!%p166_p10, %s402_s24), 31  ;;  %vm201_vm0 = vcmask 220160   ;;  %v190_v7 = vld [vmem:[%s732_s2 + $0x8] sm:$0x1]  ;;  %v556_v9 = vmov 0   ;;  %v189_v11 = vld [vmem:[%s732_s2] sm:$0xff] }
  0x14   : > { %s403_s25 = sshll.u32 %s741_s24, 3  ;;  %485 = vset.pattern.permute.xlu0 %v556_v9  ;;  %v187_v19 = vld [vmem:[%s731_s1] sm:$0xff]  ;;  %v188_v20 = vld [vmem:[%s731_s1 + $0x8] sm:$0x1]  ;;  %vm279_vm1 = vcmask 1040384   ;;  %s331_s24 = scalar_lea.hbm %s733_s3, %s423_s17 }
  0x15   : > { %s632_s28 = scalar_lea.vmem %s730_s0, %s403_s25  ;;  %198 = vperm.xlu0 %485, %v190_v7   ;;  %s164_s25 = scalar_lea.vmem [#allocation2], %s401_s11 }
  0x16   : > { %v186_v0 = vld [vmem:[%s632_s28 + $0x78] sm:$0xff]  ;;  %v185_v1 = vld [vmem:[%s632_s28 + $0x70] sm:$0xff]  ;;  %v184_v2 = vld [vmem:[%s632_s28 + $0x68] sm:$0xff]  ;;  %s332_s26 = sshll.u32 %s164_s25, 4  ;;  %s334_s27 = sshll.u32 %s331_s24, 4  ;;  %s333_s26 = int_to_ptr.vmem [resolvable:$true] %s332_s26  ;;  %s335_s27 = int_to_ptr.hbm [resolvable:$true] %s334_s27 }
  0x17   : > { %404 = vmatpush.xpose.msk.msra.mxu0 %vm201_vm0, %v186_v0  ;;  %426 = vmatpush.xpose.msk.msra.mxu1 %vm201_vm0, %v186_v0  ;;  %v183_v3 = vld [vmem:[%s632_s28 + $0x60] sm:$0xff]  ;;  %v182_v4 = vld [vmem:[%s632_s28 + $0x58] sm:$0xff]  ;;  %v181_v5 = vld [vmem:[%s632_s28 + $0x50] sm:$0xff] }
  0x18   : > { %v180_v6 = vld [vmem:[%s632_s28 + $0x48] sm:$0xff]  ;;  %v179_v8 = vld [vmem:[%s632_s28 + $0x40] sm:$0xff]  ;;  %v178_v10 = vld [vmem:[%s632_s28 + $0x38] sm:$0xff] }
  0x19   : > { %v177_v12 = vld [vmem:[%s632_s28 + $0x30] sm:$0xff]  ;;  %v176_v13 = vld [vmem:[%s632_s28 + $0x28] sm:$0xff]  ;;  %v175_v14 = vld [vmem:[%s632_s28 + $0x20] sm:$0xff] }
  0x1a   : > { %v174_v15 = vld [vmem:[%s632_s28 + $0x18] sm:$0xff]  ;;  %v173_v16 = vld [vmem:[%s632_s28 + $0x10] sm:$0xff]  ;;  %v172_v17 = vld [vmem:[%s632_s28 + $0x8] sm:$0xff] }
  0x1b   : > { %405 = vmatpush.xpose.msk.msra.mxu0 %vm201_vm0, %v185_v1  ;;  %427 = vmatpush.xpose.msk.msra.mxu1 %vm201_vm0, %v185_v1  ;;  %v171_v18 = vld [vmem:[%s632_s28] sm:$0xff]  ;;  %s506_s28 = sshra.s32 %s335_s27, 4  ;;  %s507_s28 = int_to_ptr.hbm [resolvable:$true] %s506_s28 }
  0x1c   : > { %s508_s29 = scalar_lea.hbm %s507_s28, 16  ;;  %p513_p0 = scmp.lt.s32.totalorder %s507_s28, %s733_s3 }
  0x1d   : > { %193 = vperm.xlu0 %485, %v189_v11   ;;  %p509_p11 = scmp.ne.s32.totalorder %s507_s28, %s508_s29  ;;  %p514_p1 = scmp.lt.s32.totalorder %s512_s5, %s508_s29 }
  0x1f   : > { %406 = vmatpush.xpose.msk.msra.mxu0 %vm201_vm0, %v184_v2  ;;  %428 = vmatpush.xpose.msk.msra.mxu1 %vm201_vm0, %v184_v2  ;;  %p510_p12 = pnand %p509_p11, %p618_p5  ;;  %p515_p2 = por %p514_p1, %p513_p0 }
  0x21   : > { %p511_p13 = pneg %p510_p12 }
  0x23   : > { %407 = vmatpush.xpose.msk.msra.mxu0 %vm201_vm0, %v183_v3  ;;  %429 = vmatpush.xpose.msk.msra.mxu1 %vm201_vm0, %v183_v3  ;;  %p516_p3 = pnand %p515_p2, %p511_p13 }
  0x27   : > { %408 = vmatpush.xpose.msk.msra.mxu0 %vm201_vm0, %v182_v4  ;;  %430 = vmatpush.xpose.msk.msra.mxu1 %vm201_vm0, %v182_v4 }
  0x2b   : > { %409 = vmatpush.xpose.msk.msra.mxu0 %vm201_vm0, %v181_v5  ;;  %431 = vmatpush.xpose.msk.msra.mxu1 %vm201_vm0, %v181_v5 }
  0x2f   : > { %410 = vmatpush.xpose.msk.msra.mxu0 %vm201_vm0, %v180_v6  ;;  %432 = vmatpush.xpose.msk.msra.mxu1 %vm201_vm0, %v180_v6 }
  0x33   : > { %411 = vmatpush.xpose.msk.msra.mxu0 %vm201_vm0, %v179_v8  ;;  %433 = vmatpush.xpose.msk.msra.mxu1 %vm201_vm0, %v179_v8 }
  0x37   : > { %412 = vmatpush.xpose.msk.msra.mxu0 %vm201_vm0, %v178_v10  ;;  %434 = vmatpush.xpose.msk.msra.mxu1 %vm201_vm0, %v178_v10 }
  0x3b   : > { %413 = vmatpush.xpose.msk.msra.mxu0 %vm201_vm0, %v177_v12  ;;  %435 = vmatpush.xpose.msk.msra.mxu1 %vm201_vm0, %v177_v12 }
  0x3f   : > { %414 = vmatpush.xpose.msk.msra.mxu0 %vm201_vm0, %v176_v13  ;;  %436 = vmatpush.xpose.msk.msra.mxu1 %vm201_vm0, %v176_v13 }
  0x43   : > { %415 = vmatpush.xpose.msk.msra.mxu0 %vm201_vm0, %v175_v14  ;;  %437 = vmatpush.xpose.msk.msra.mxu1 %vm201_vm0, %v175_v14 }
  0x47   : > { %416 = vmatpush.xpose.msk.msra.mxu0 %vm201_vm0, %v174_v15  ;;  %438 = vmatpush.xpose.msk.msra.mxu1 %vm201_vm0, %v174_v15 }
  0x4b   : > { %417 = vmatpush.xpose.msk.msra.mxu0 %vm201_vm0, %v173_v16  ;;  %439 = vmatpush.xpose.msk.msra.mxu1 %vm201_vm0, %v173_v16 }
  0x4f   : > { %418 = vmatpush.xpose.msk.msra.mxu0 %vm201_vm0, %v172_v17  ;;  %440 = vmatpush.xpose.msk.msra.mxu1 %vm201_vm0, %v172_v17 }
  0x53   : > { %419 = vmatpush.xpose.msk.msra.mxu0 %vm201_vm0, %v171_v18  ;;  %441 = vmatpush.xpose.msk.msra.mxu1 %vm201_vm0, %v171_v18 }
  0x56   : > { %420 = vmatmul.msk.f32.vlgmr.msra.gmra.mxu0 %vm201_vm0, %v187_v19  ;;  %421 = vmatmul.msk.f32.vlgmr.msra.gmra.mxu1 %vm201_vm0, %v188_v20 }
  0x87   : > { %v199_v21 = vpop.permute.xlu0 %198 }
  0x8f   : > { %v194_v22 = vpop.permute.xlu0 %193 }
  0xd3   : > { %v273_v23 = vpop.f32.mrf.mxu0  ;;  %v276_v24 = vpop.f32.mrf.mxu1 }
  0xd4   : > { %v274_v25 = vadd.f32 %v273_v23, %v194_v22  ;;  %v277_v26 = vadd.f32 %v276_v24, %v199_v21 }
  0xd6   : > { %v280_v27 = vsel %vm279_vm1, %v277_v26, -inf }
  0xd7   : > { %v281_v28 = vmax.f32 %v274_v25, %v280_v27 }
  0xd9   : > { %v282_v29 = vrot.slane %v281_v28, 4 }
  0xdb   : > { %v283_v30 = vmax.f32 %v281_v28, %v282_v29 }
  0xdd   : > { %v284_v31 = vrot.slane %v283_v30, 2 }
  0xdf   : > { %v285_v32 = vmax.f32 %v283_v30, %v284_v31 }
  0xe1   : > { %v286_v33 = vrot.slane %v285_v32, 1 }
  0xe3   : > { %v287_v34 = vmax.f32 %v285_v32, %v286_v33 }
  0xe5   : > { %v288_v35 = vsub.f32 %v274_v25, %v287_v34  ;;  %v289_v36 = vsub.f32 %v277_v26, %v287_v34 }
  0xe7   : > { %v290_v37 = vmul.f32 1.442695, %v288_v35  ;;  %v292_v38 = vmul.f32 1.442695, %v289_v36 }
  0xe9   : > { %486 = vpow2.f32 %v290_v37 }
  0xea   : > { %488 = vpow2.f32 %v292_v38 }
  0xef   : > { %v487_v39 = vpop.eup %486 }
  0xf0   : > { %v489_v40 = vpop.eup %488 }
  0xf1   : > { %v294_v41 = vsel %vm279_vm1, %v489_v40, 0.0 }
  0xf2   : > { %v295_v42 = vadd.f32 %v487_v39, %v294_v41 }
  0xf4   : > { %v296_v43 = vrot.slane %v295_v42, 4 }
  0xf6   : > { %v297_v44 = vadd.f32 %v296_v43, %v295_v42 }
  0xf8   : > { %v298_v45 = vrot.slane %v297_v44, 2 }
  0xfa   : > { %v299_v46 = vadd.f32 %v298_v45, %v297_v44 }
  0xfc   : > { %v300_v47 = vrot.slane %v299_v46, 1 }
  0xfe   : > { %v301_v48 = vadd.f32 %v300_v47, %v299_v46 }
 0x100   : > { %490 = vrcp.f32 %v301_v48  ;;  %v313_v52 = vand.u32 2147483648, %v301_v48  ;;  %v311_v54 = vand.u32 2147483647, %v301_v48  ;;  %vm307_vm3 = vweird.f32 %v301_v48 }
 0x102   : > { %v314_v56 = vor.u32 1.1754944e-38, %v313_v52  ;;  %vm312_vm5 = vcmp.eq.f32.partialorder %v311_v54, 8.507059e+37 }
 0x106   : > { %v491_v49 = vpop.eup %490 }
 0x107   : > { %v303_v50 = vmul.f32 %v491_v49, %v301_v48  ;;  %vm308_vm2 = vweird.f32 %v491_v49 }
 0x108   : > { %vm309_vm4 = vmor %vm307_vm3, %vm308_vm2 }
 0x109   : > { %v304_v51 = vsub.f32 1.0, %v303_v50 }
 0x10b   : > { %v305_v53 = vmul.f32 %v491_v49, %v304_v51 }
 0x10d   : > { %v306_v55 = vadd.f32 %v491_v49, %v305_v53 }
 0x10f   : > { %v310_v57 = vsel %vm309_vm4, %v491_v49, %v306_v55 }
 0x110   : > { %v315_v58 = vsel %vm312_vm5, %v314_v56, %v310_v57 }
 0x111   : > { %v316_v59 = vmul.f32 %v487_v39, %v315_v58  ;;  %v317_v60 = vmul.f32 %v489_v40, %v315_v58 }
 0x113   : > { %318 = vst [vmem:[%s164_s25] sm:$0xff] %v316_v59 }
 0x114   : > { %319 = vst [vmem:[%s164_s25 + $0x8] sm:$0x1] %v317_v60 }
 0x115   : > { %519 = shalt.err (!%p516_p3)
}
 0x116   : > { %s557_s8 = smov 128   ;;  %s558_s9 = smov 256  }
 0x117   : > { %s559_s10 = smov 8  }
 0x118   : > { %442 = dma.vmem_to_hbm [thread:$0]  (%p618_p5), %s333_s26, 256, %s335_s27, %s321_s16, %s557_s8, %s558_s9, %s559_s10  }
 0x119 PF: > { %p448_p4 = scmp.ge.s32.totalorder %s554_s15, 2  ;;  %s349_s11 = sand.u32 1, %s542_s12  }
 0x11a   : > { %s350_s17 = scalar_lea.sflag [#allocation3], %s349_s11 }
 0x11b   : > { %p445_p7 = pnand %p448_p4, %p622_p6 }
 0x11d   : > { %p446_p8 = pneg %p445_p7 }
 0x11f   : > { %537 = dma.done.wait (%p446_p8), %s350_s17, 256  }
 0x120   : > { %539 = vsyncadd (%p446_p8), %s350_s17, 4294967040  ;;  %p13_p9 = scmp.ge.s32.totalorder %s605_s18, 4   ;;  %s736_s12 = smov %s546_s13 }
 0x121   : > { %s737_s13 = smov %s550_s14  ;;  %s738_s14 = smov %s616_s21 }
 0x122   : > { %s739_s15 = smov %s605_s18  ;;  %15 = sbr.rel (!%p13_p9) target bundleno = 3 (0x3), region = 67 }
 0x127   :  { %356 = vsyncpa [#allocation3], 1 }
 0x128   :  { %358 = vsyncpa [#allocation3 + $0x1], 1 }

</bundles_post_ra>
